<compile_context>
chip_gen: v7x
topology: tpu7x:2x2x1
jax: 0.10.0
libtpu: 0.0.40
codegen_flags: <defaults>
</compile_context>

<pallas_src>
import jax
import jax.numpy as jnp
from jax.experimental import pallas as pl
from jax.experimental.pallas import tpu as pltpu


def _smooth_ce_kernel(pred_ref, truth_ref, out_ref):
    # pred_ref / truth_ref: (tile_r, 8, 128); out_ref: (1, 8, 128)
    p = pred_ref[...]
    t = truth_ref[...]
    if p.dtype != jnp.float32:  # only cast if the caller gave sub-f32 inputs
        p = p.astype(jnp.float32)
        t = t.astype(jnp.float32)

    eps = jnp.float32(1e-8)
    # t*log((t+eps)/(p+eps)) == -log(p+eps)*t + log(t+eps)*t  (one EUP log per elem)
    term = t * jnp.log((t + eps) / (p + eps))
    # Reduce only along the leading (vreg-block) axis: pure vreg-wise VPU adds.
    out_ref[...] = jnp.sum(term, axis=0, keepdims=True)


def smooth_cross_entropy_loss(pred, truth, *, block_rows=1024):
    """pred, truth: (N, C) soft distributions. Returns scalar f32 loss.

    block_rows = number of (8,128) vreg blocks per grid step (1024 -> 4 MiB/block).
    """
    assert pred.shape == truth.shape and pred.ndim == 2
    n, c = pred.shape
    e = n * c

    VREG = 8 * 128                       # elements per f32 (8,128) vreg block
    num_vregs = pl.cdiv(e, VREG)         # vreg blocks needed to cover all elements
    tile_r = min(block_rows, num_vregs)  # vreg blocks per grid step
    grid = pl.cdiv(num_vregs, tile_r)
    padded_e = grid * tile_r * VREG

    def _prep(x):
        flat = x.reshape(-1)
        pad = padded_e - e
        if pad:
            # zero-padding contributes exactly 0 to the loss sum
            flat = jnp.pad(flat, (0, pad))
        return flat.reshape(grid * tile_r, 8, 128)

    p3 = _prep(pred)
    t3 = _prep(truth)

    partials = pl.pallas_call(
        _smooth_ce_kernel,
        out_shape=jax.ShapeDtypeStruct((grid, 8, 128), jnp.float32),
        grid_spec=pltpu.PrefetchScalarGridSpec(
            num_scalar_prefetch=0,
            grid=(grid,),
            in_specs=[
                pl.BlockSpec((tile_r, 8, 128), lambda i: (i, 0, 0)),
                pl.BlockSpec((tile_r, 8, 128), lambda i: (i, 0, 0)),
            ],
            out_specs=pl.BlockSpec((1, 8, 128), lambda i: (i, 0, 0)),
        ),
        compiler_params=pltpu.CompilerParams(
            # No carried state between steps -> safe to shard across TCs (v7x megacore).
            dimension_semantics=("parallel",),
            # 16 MiB of double-buffered input blocks + headroom; valid on v5e/v6e/v7x.
            vmem_limit_bytes=32 * 1024 * 1024,
        ),
    )(p3, t3)

    # Tiny epilogue reduce + batch mean in JAX (grid * 4 KiB of partials).
    return jnp.sum(partials) / jnp.float32(n)


def _reference(pred, truth):
    return jnp.mean(
        -(jnp.log(pred + 1e-8) * truth).sum(1)
        + (jnp.log(truth + 1e-8) * truth).sum(1)
    )


if __name__ == "__main__":
    key = jax.random.PRNGKey(0)
    k1, k2 = jax.random.split(key)

    N, C = 16, 32  # small batch of soft-label distributions
    pred_logits = jax.random.normal(k1, (N, C), dtype=jnp.float32)
    truth_logits = jax.random.normal(k2, (N, C), dtype=jnp.float32)
    pred = jax.nn.softmax(pred_logits, axis=1)
    truth = jax.nn.softmax(truth_logits, axis=1)

    loss = jax.block_until_ready(smooth_cross_entropy_loss(pred, truth))
    ref = jax.block_until_ready(_reference(pred, truth))

    assert jnp.allclose(loss, ref, rtol=1e-4, atol=1e-6), (loss, ref)
    print("KERNEL_OK")
</pallas_src>

<mosaic_0001>
module attributes {stable_mosaic.version = 11 : i64} {
  func.func @_smooth_ce_kernel(%arg0: i32, %arg1: memref<1x8x128xf32, #tpu.memory_space<vmem>>, %arg2: memref<1x8x128xf32, #tpu.memory_space<vmem>>, %arg3: memref<1x8x128xf32, #tpu.memory_space<vmem>>) attributes {dimension_semantics = [#tpu.dimension_semantics<parallel>], iteration_bounds = array<i64: 1>, scalar_prefetch = 0 : i64, scratch_operands = 0 : i64, tpu.core_type = #tpu.core_type<tc>, window_params = [{transform_indices = @transform_0, window_bounds = array<i64: 1, 8, 128>}, {transform_indices = @transform_1, window_bounds = array<i64: 1, 8, 128>}, {transform_indices = @transform_2, window_bounds = array<i64: 1, 8, 128>}]} {
    %c0 = arith.constant 0 : index
    %c0_0 = arith.constant 0 : index
    %c0_1 = arith.constant 0 : index
    %0 = vector.load %arg1[%c0, %c0_0, %c0_1] : memref<1x8x128xf32, #tpu.memory_space<vmem>>, vector<1x8x128xf32>
    %c0_2 = arith.constant 0 : index
    %c0_3 = arith.constant 0 : index
    %c0_4 = arith.constant 0 : index
    %1 = vector.load %arg2[%c0_2, %c0_3, %c0_4] : memref<1x8x128xf32, #tpu.memory_space<vmem>>, vector<1x8x128xf32>
    %cst = arith.constant 9.99999993E-9 : f32
    %2 = vector.broadcast %cst : f32 to vector<1x8x128xf32>
    %3 = arith.addf %1, %2 : vector<1x8x128xf32>
    %cst_5 = arith.constant 9.99999993E-9 : f32
    %4 = vector.broadcast %cst_5 : f32 to vector<1x8x128xf32>
    %5 = arith.addf %0, %4 : vector<1x8x128xf32>
    %6 = arith.divf %3, %5 : vector<1x8x128xf32>
    %7 = math.log %6 : vector<1x8x128xf32>
    %8 = arith.mulf %1, %7 : vector<1x8x128xf32>
    %cst_6 = arith.constant dense<0.000000e+00> : vector<8x128xf32>
    %9 = vector.multi_reduction <add>, %8, %cst_6 [0] : vector<1x8x128xf32> to vector<8x128xf32>
    %10 = vector.shape_cast %9 : vector<8x128xf32> to vector<1x8x128xf32>
    %c0_7 = arith.constant 0 : index
    %c0_8 = arith.constant 0 : index
    %c0_9 = arith.constant 0 : index
    %11 = vector.load %arg3[%c0_7, %c0_8, %c0_9] : memref<1x8x128xf32, #tpu.memory_space<vmem>>, vector<1x8x128xf32>
    tpu.vector_store %arg3[%c0_7, %c0_8, %c0_9], %10 {strides = array<i32>} : memref<1x8x128xf32, #tpu.memory_space<vmem>>, vector<1x8x128xf32>,
    return
  }
  func.func @transform_0(%arg0: i32) -> (i32, i32, i32) {
    %c0_i32 = arith.constant 0 : i32
    %c0_i32_0 = arith.constant 0 : i32
    %c0_i32_1 = arith.constant 0 : i32
    return %arg0, %c0_i32, %c0_i32_0 : i32, i32, i32
  }
  func.func @transform_1(%arg0: i32) -> (i32, i32, i32) {
    %c0_i32 = arith.constant 0 : i32
    %c0_i32_0 = arith.constant 0 : i32
    %c0_i32_1 = arith.constant 0 : i32
    return %arg0, %c0_i32, %c0_i32_0 : i32, i32, i32
  }
  func.func @transform_2(%arg0: i32) -> (i32, i32, i32) {
    %c0_i32 = arith.constant 0 : i32
    %c0_i32_0 = arith.constant 0 : i32
    %c0_i32_1 = arith.constant 0 : i32
    return %arg0, %c0_i32, %c0_i32_0 : i32, i32, i32
  }
}

</mosaic_0001>

<bundles_post_ra>
// kernel: tpu_custom_call.1
= control target key start
LH: loop header
LB: loop body
LE: loop exit
PB: predicated region body
PF: predicated region fallthrough
CT: control target
= control target key end

     0   :  { %7 = vsyncpa [#allocation3], 0  ;;  %s196_s0 = inlined_call_operand.hbm [shape: f32[1,8,128], index: 0, kind: input, shape index: {}]   ;;  %s197_s1 = inlined_call_operand.hbm [shape: f32[1,8,128], index: 1, kind: input, shape index: {}]   ;;  %s198_s2 = inlined_call_operand.hbm [shape: f32[1,8,128], index: 2, kind: output, shape index: {}]  }
   0x1   :  { %8 = vsyncpa [#allocation6], 0 }
   0x2   :  { %9 = vsyncpa [#allocation4], 0  ;;  %s142_s9 = smov [#allocation2]   ;;  %s143_s11 = smov [#allocation5]  }
   0x3   :  { %s16_s10 = sshll.u32 %s142_s9, 4  ;;  %s26_s12 = sshll.u32 %s143_s11, 4  ;;  %s17_s10 = int_to_ptr.vmem [resolvable:$true] %s16_s10  ;;  %s27_s12 = int_to_ptr.vmem [resolvable:$true] %s26_s12 }
   0x4   :  { %s70_s15 = scalar_lea.hbm %s196_s0, 128 }
   0x5   :  { %p71_p0 = scmp.ne.s32.totalorder %s196_s0, %s70_s15  ;;  %p74_p1 = scmp.lt.u32.totalorder %s70_s15, %s196_s0 }
   0x7   :  { %p76_p2 = pnand %p74_p1, %p71_p0 }
   0x9   :  { %79 = shalt.err (!%p76_p2)
}
   0xa   :  { %s80_s20 = scalar_lea.vmem %s17_s10, 128  ;;  %p85_p4 = scmp.lt.s32.totalorder %s17_s10, %s17_s10 }
   0xb   :  { %p81_p3 = scmp.ne.s32.totalorder %s17_s10, %s80_s20  ;;  %p86_p5 = scmp.lt.s32.totalorder %s80_s20, %s80_s20 }
   0xd   :  { %p87_p6 = por %p86_p5, %p85_p4 }
   0xf   :  { %p88_p7 = pnand %p87_p6, %p81_p3 }
  0x11   :  { %91 = shalt.err (!%p88_p7)
}
  0x12   :  { %19 = dma.hbm_to_vmem [thread:$0]  %s196_s0, 128, %s17_s10, [#allocation3]  }
  0x13   :  { %s92_s25 = scalar_lea.hbm %s197_s1, 128 }
  0x14   :  { %p93_p8 = scmp.ne.s32.totalorder %s197_s1, %s92_s25  ;;  %p96_p9 = scmp.lt.u32.totalorder %s92_s25, %s197_s1 }
  0x16   :  { %p98_p10 = pnand %p96_p9, %p93_p8 }
  0x18   :  { %101 = shalt.err (!%p98_p10)
}
  0x19   :  { %s102_s30 = scalar_lea.vmem %s27_s12, 128  ;;  %p107_p12 = scmp.lt.s32.totalorder %s27_s12, %s27_s12 }
  0x1a   :  { %p103_p11 = scmp.ne.s32.totalorder %s27_s12, %s102_s30  ;;  %p108_p13 = scmp.lt.s32.totalorder %s102_s30, %s102_s30 }
  0x1c   :  { %p109_p0 = por %p108_p13, %p107_p12 }
  0x1e   :  { %p110_p1 = pnand %p109_p0, %p103_p11 }
  0x20   :  { %113 = shalt.err (!%p110_p1)
}
  0x21   :  { %29 = dma.hbm_to_vmem [thread:$0]  %s197_s1, 128, %s27_s12, [#allocation6]  }
  0x22   :  { %136 = dma.done.wait [#allocation3], 128  }
  0x23   :  { %137 = vsyncadd [#allocation3], 4294967168 }
  0x24   :  { %138 = dma.done.wait [#allocation6], 128  }
  0x25   :  { %139 = vsyncadd [#allocation6], 4294967168  ;;  %v36_v0 = vld [vmem:[#allocation2] sm:$0xff]  ;;  %v37_v2 = vld [vmem:[#allocation5] sm:$0xff]  ;;  %s144_s4 = smov [#allocation7]  }
  0x26   :  { %v39_v1 = vadd.f32 1e-08, %v36_v0  ;;  %v38_v3 = vadd.f32 1e-08, %v37_v2  ;;  %s53_s5 = sshll.u32 %s144_s4, 4  ;;  %s54_s5 = int_to_ptr.vmem [resolvable:$true] %s53_s5 }
  0x27   :  { %s114_s1 = scalar_lea.vmem %s54_s5, 128  ;;  %p119_p3 = scmp.lt.s32.totalorder %s54_s5, %s54_s5 }
  0x28   :  { %66 = vrcp.f32 %v39_v1  ;;  %p115_p2 = scmp.ne.s32.totalorder %s54_s5, %s114_s1  ;;  %p120_p4 = scmp.lt.s32.totalorder %s114_s1, %s114_s1 }
  0x2a   :  { %p121_p5 = por %p120_p4, %p119_p3 }
  0x2c   :  { %p122_p6 = pnand %p121_p5, %p115_p2 }
  0x32   :  { %v67_v4 = vpop.eup %66 }
  0x33   :  { %v41_v5 = vmul.f32 %v67_v4, %v38_v3 }
  0x35   :  { %68 = vlog2.f32 %v41_v5 }
  0x3f   :  { %v69_v6 = vpop.eup %68 }
  0x40   :  { %v43_v7 = vmul.f32 0.6931472, %v69_v6 }
  0x42   :  { %v44_v8 = vmul.f32 %v43_v7, %v37_v2 }
  0x44   :  { %46 = vst [vmem:[#allocation7] sm:$0xff] %v44_v8 }
  0x45   :  { %125 = shalt.err (!%p122_p6)
}
  0x46   :  { %s126_s8 = scalar_lea.hbm %s198_s2, 128 }
  0x47   :  { %p127_p7 = scmp.ne.s32.totalorder %s198_s2, %s126_s8  ;;  %p130_p8 = scmp.lt.u32.totalorder %s126_s8, %s198_s2 }
  0x49   :  { %p132_p9 = pnand %p130_p8, %p127_p7 }
  0x4b   :  { %135 = shalt.err (!%p132_p9)
}
  0x4c   :  { %56 = dma.vmem_to_hbm [thread:$0]  %s54_s5, 128, %s198_s2, [#allocation4]  }
  0x4d   :  { %140 = dma.done.wait [#allocation4], 128  }
  0x4e   :  { %141 = vsyncadd [#allocation4], 4294967168 }
  0x4f   :  { %60 = vsyncpa [#allocation3], 1 }
  0x50   :  { %61 = vsyncpa [#allocation6], 1 }
  0x51   :  { %62 = vsyncpa [#allocation4], 1 }

</bundles_post_ra>
